<compile_context>
chip_gen: v6e
topology: v6e:2x2x1
jax: 0.10.0
libtpu: 0.0.40
codegen_flags: <defaults>
</compile_context>

<pallas_src>
import jax
import jax.numpy as jnp
from jax.experimental import pallas as pl
from jax.experimental.pallas import tpu as pltpu


def _indrnn_kernel(x_ref, wih_t_ref, b_ref, whh_ref, out_ref, h_scratch, pre_scratch):
    """One grid step == one (hidden-tile, time-block).

    x_ref       : (TT*B, I)  bf16  folded time-block of inputs (rows = time-major)
    wih_t_ref   : (I, TH)    bf16  W_ih^T hidden tile (constant along time axis)
    b_ref       : (1, TH)    f32   bias_ih tile
    whh_ref     : (1, TH)    f32   element-wise recurrent weight tile
    out_ref     : (TT*B, TH)       hidden states for this (time block, hidden tile)
    h_scratch   : (B, TH)    f32   hidden-state carry across time blocks
    pre_scratch : (TT*B, TH) f32   per-block pre-activations (x @ W_ih^T)
    """
    t_blk = pl.program_id(1)

    @pl.when(t_blk == 0)
    def _():
        h_scratch[...] = jnp.zeros_like(h_scratch)

    M = x_ref.shape[0]
    TH = wih_t_ref.shape[1]
    B = h_scratch.shape[0]
    TT = M // B

    # Time-independent projection for the whole block: one MXU matmul with
    # M = TT*B rows, bf16 operands, f32 accumulation.
    pre_scratch[...] = jnp.dot(
        x_ref[...], wih_t_ref[...], preferred_element_type=jnp.float32
    )

    # Hoist the (1, TH) -> (B, TH) broadcasts out of the sequential loop
    # (JAX does not CSE broadcast_in_dim).
    bias = jnp.broadcast_to(b_ref[...], (B, TH))
    whh = jnp.broadcast_to(whh_ref[...], (B, TH))

    def step(i, h):
        r = pl.multiple_of(i * B, B)
        pre_i = pre_scratch[pl.ds(r, B), :]
        # Bias fused here instead of a separate full-block pass over `pre`.
        h_new = jnp.maximum(pre_i + bias + whh * h, 0.0)  # relu nonlinearity
        out_ref[pl.ds(r, B), :] = h_new.astype(out_ref.dtype)
        return h_new

    h_scratch[...] = jax.lax.fori_loop(
        0, TT, step, h_scratch[...], unroll=min(8, TT)
    )


def _round_up(x, m):
    return (x + m - 1) // m * m


def _tpu_generation():
    """Best-effort TPU generation (5/6/7) from device_kind; defaults to 6."""
    try:
        kind = jax.devices()[0].device_kind.lower()
    except Exception:
        return 6
    for g in (7, 6, 5, 4):
        if "v%d" % g in kind:
            return g
    return 6


def _pick_hidden_tile(h_pad, gen):
    """Hidden-tile width TH (multiple of 128 dividing h_pad).

    * capped at 512 (bounds the resident (I, TH) weight tile / VMEM)
    * prefer multiples of 256 on v6e/v7x (2x256x256 MXU); 384 only kept for v5e
    * on v7x, keep >= 2 hidden tiles so the 'parallel' axis shards over both TCs
    """
    cap = min(h_pad, 512)
    if gen >= 7 and h_pad > 128:
        cap = min(cap, max(128, (h_pad // 2) // 128 * 128))
    prefs = (512, 384, 256, 128) if gen <= 5 else (512, 256, 128)
    for th in prefs:
        if th <= cap and h_pad % th == 0:
            return th
    th = cap // 128 * 128
    while th > 128 and h_pad % th != 0:
        th -= 128
    return max(th, 128)


def _pick_time_block(T, B, target_rows=512):
    """Time block TT such that M = TT*B fills the MXU (target ~512 rows) and the
    folded (TT*B, ...) blocks stay sublane-divisible (TT*B % 8 == 0) unless a
    single block covers the whole sequence."""
    TT = max(1, min(T, -(-target_rows // B)))
    while TT < T and (TT * B) % 8 != 0:
        TT += 1
    return min(TT, T)


def indrnn_layer_pallas(x, w_ih, b_ih, w_hh, *, target_rows=512):
    """Single IndRNN layer over the full sequence.

    x    : (T, B, I)  time-major input
    w_ih : (H, I)     torch-convention input->hidden weight
    b_ih : (H,)
    w_hh : (H,)
    returns (out, h_n) with out: (T, B, H), h_n: (B, H)
    """
    T, B, I = x.shape
    H = w_ih.shape[0]
    out_dtype = x.dtype
    gen = _tpu_generation()

    # Pad hidden dim to a lane-dense multiple of 128 and time dim to a multiple
    # of the time block (padded timesteps / hidden columns are computed and
    # discarded; the forward recurrence + zero padding keeps real outputs exact).
    H_pad = _round_up(H, 128)
    TH = _pick_hidden_tile(H_pad, gen)
    TT = _pick_time_block(T, B, target_rows)
    T_pad = _round_up(T, TT)

    if T_pad != T:
        x = jnp.pad(x, ((0, T_pad - T), (0, 0), (0, 0)))

    # Fold (T, B) -> one sublane-dense leading dim; bf16 MXU operands.
    x_flat = x.reshape(T_pad * B, I).astype(jnp.bfloat16)
    wih_t = jnp.transpose(w_ih).astype(jnp.bfloat16)  # (I, H)
    b = b_ih.astype(jnp.float32)
    whh = w_hh.astype(jnp.float32)
    if H_pad != H:
        wih_t = jnp.pad(wih_t, ((0, 0), (0, H_pad - H)))
        b = jnp.pad(b, (0, H_pad - H))
        whh = jnp.pad(whh, (0, H_pad - H))
    b = b.reshape(1, H_pad)
    whh = whh.reshape(1, H_pad)

    M = TT * B
    grid = (H_pad // TH, T_pad // TT)

    # Explicit VMEM budget: double-buffered x/out blocks, resident bf16 weight
    # tile, f32 pre/carry scratch, 2x headroom; kept below v7x's 64 MiB physical.
    out_bytes = jnp.dtype(out_dtype).itemsize
    est = (
        2 * M * I * 2            # x blocks (bf16, double-buffered)
        + 2 * M * TH * out_bytes  # out blocks (double-buffered)
        + 2 * I * TH * 2          # W_ih^T tile (bf16, double-buffered)
        + 4 * 8 * TH * 4          # bias / w_hh tiles (sublane-padded f32)
        + M * TH * 4              # pre scratch (f32)
        + 8 * TH * 4              # h carry (f32, sublane-padded)
    )
    cap = (60 if gen >= 7 else 100) * (1 << 20)
    vmem_limit = int(min(cap, max(32 << 20, 2 * est)))

    out = pl.pallas_call(
        _indrnn_kernel,
        out_shape=jax.ShapeDtypeStruct((T_pad * B, H_pad), out_dtype),
        grid_spec=pltpu.PrefetchScalarGridSpec(
            num_scalar_prefetch=0,
            grid=grid,
            in_specs=[
                pl.BlockSpec((M, I), lambda h, t: (t, 0)),
                pl.BlockSpec((I, TH), lambda h, t: (0, h)),
                pl.BlockSpec((1, TH), lambda h, t: (0, h)),
                pl.BlockSpec((1, TH), lambda h, t: (0, h)),
            ],
            out_specs=pl.BlockSpec((M, TH), lambda h, t: (t, h)),
            scratch_shapes=[
                pltpu.VMEM((B, TH), jnp.float32),  # hidden-state carry
                pltpu.VMEM((M, TH), jnp.float32),  # block pre-activations
            ],
        ),
        # Hidden tiles are independent -> parallel (megacore); time carries the
        # h_scratch state and must stay the innermost "arbitrary" axis.
        compiler_params=pltpu.CompilerParams(
            dimension_semantics=("parallel", "arbitrary"),
            vmem_limit_bytes=vmem_limit,
        ),
    )(x_flat, wih_t, b, whh)

    out = out.reshape(T_pad, B, H_pad)[:T, :, :H]
    h_n = out[T - 1]
    return out, h_n


def indrnn_forward(x, params):
    """Multi-layer IndRNN forward (time-major, uni-directional, no batch-norm).

    x      : (T, B, input_size)
    params : list of (w_ih, b_ih, w_hh) per layer
    returns (output, h_n):
      output : (T, B, H)
      h_n    : (B, H * num_layers)
    """
    hiddens = []
    for (w_ih, b_ih, w_hh) in params:
        x, h_last = indrnn_layer_pallas(x, w_ih, b_ih, w_hh)
        hiddens.append(h_last)
    return x, jnp.concatenate(hiddens, axis=-1)


def _init_params(key, input_size, hidden_size, num_layers):
    """Deterministic init mirroring IndRNNCell.reset_parameters (defaults)."""
    params = []
    for i in range(num_layers):
        in_size = input_size if i == 0 else hidden_size
        key, sub = jax.random.split(key)
        w_ih = 0.01 * jax.random.normal(sub, (hidden_size, in_size), jnp.float32)
        b_ih = jnp.zeros((hidden_size,), jnp.float32)
        w_hh = jnp.ones((hidden_size,), jnp.float32)  # constant-1 init; check_bounds no-op
        params.append((w_ih, b_ih, w_hh))
    return params


def _reference_forward(x, params):
    """Pure-JAX reference.  Emulates the kernel's bf16 MXU projection (f32
    accumulation); bias / recurrence stay f32, matching the kernel exactly."""
    hiddens = []
    for (w_ih, b_ih, w_hh) in params:
        T, B, _ = x.shape
        H = w_ih.shape[0]
        x_bf = x.astype(jnp.bfloat16)
        wih_t_bf = jnp.transpose(w_ih).astype(jnp.bfloat16)

        def step(h, x_t):
            pre = jnp.dot(x_t, wih_t_bf, preferred_element_type=jnp.float32)
            h_new = jax.nn.relu(pre + b_ih + w_hh * h)
            return h_new, h_new

        h0 = jnp.zeros((B, H), jnp.float32)
        h_last, out = jax.lax.scan(step, h0, x_bf)
        x = out.astype(x.dtype)
        hiddens.append(h_last.astype(x.dtype))
    return x, jnp.concatenate(hiddens, axis=-1)


if __name__ == "__main__":
    seq_len, batch, input_size, hidden_size, num_layers = 8, 2, 4, 32, 2

    key = jax.random.PRNGKey(0)
    key_x, key_p = jax.random.split(key)
    # time-major input, matching the PyTorch default (seq_len, batch, input_size)
    x = jax.random.normal(key_x, (seq_len, batch, input_size), jnp.float32)
    params = _init_params(key_p, input_size, hidden_size, num_layers)

    fwd = jax.jit(indrnn_forward)
    out, h_n = jax.block_until_ready(fwd(x, params))
    ref_out, ref_h_n = _reference_forward(x, params)

    assert out.shape == (seq_len, batch, hidden_size)
    assert h_n.shape == (batch, hidden_size * num_layers)
    assert jnp.allclose(out, ref_out, atol=1e-4, rtol=1e-4), float(
        jnp.max(jnp.abs(out - ref_out))
    )
    assert jnp.allclose(h_n, ref_h_n, atol=1e-4, rtol=1e-4), float(
        jnp.max(jnp.abs(h_n - ref_h_n))
    )

    print("KERNEL_OK")
</pallas_src>

<mosaic_0001>
module attributes {stable_mosaic.version = 11 : i64} {
  func.func @_indrnn_kernel(%arg0: i32, %arg1: i32, %arg2: memref<16x32xbf16, #tpu.memory_space<vmem>>, %arg3: memref<32x128xbf16, #tpu.memory_space<vmem>>, %arg4: memref<1x128xf32, #tpu.memory_space<vmem>>, %arg5: memref<1x128xf32, #tpu.memory_space<vmem>>, %arg6: memref<16x128xf32, #tpu.memory_space<vmem>>, %arg7: memref<2x128xf32, #tpu.memory_space<vmem>>, %arg8: memref<16x128xf32, #tpu.memory_space<vmem>>) attributes {dimension_semantics = [#tpu.dimension_semantics<parallel>, #tpu.dimension_semantics<arbitrary>], iteration_bounds = array<i64: 1, 1>, scalar_prefetch = 0 : i64, scratch_operands = 2 : i64, tpu.core_type = #tpu.core_type<tc>, window_params = [{transform_indices = @transform_0, window_bounds = array<i64: 16, 32>}, {transform_indices = @transform_1, window_bounds = array<i64: 32, 128>}, {transform_indices = @transform_2, window_bounds = array<i64: 1, 128>}, {transform_indices = @transform_3, window_bounds = array<i64: 1, 128>}, {transform_indices = @transform_4, window_bounds = array<i64: 16, 128>}]} {
    %c0_i32 = arith.constant 0 : i32
    %0 = arith.cmpi eq, %arg1, %c0_i32 : i32
    %1 = arith.extui %0 : i1 to i32
    %c0_i32_0 = arith.constant 0 : i32
    %2 = arith.cmpi ne, %1, %c0_i32_0 : i32
    scf.if %2 {
      %cst_47 = arith.constant 0.000000e+00 : f32
      %103 = vector.broadcast %cst_47 : f32 to vector<2x128xf32>
      %c0_48 = arith.constant 0 : index
      %c0_49 = arith.constant 0 : index
      %104 = vector.load %arg7[%c0_48, %c0_49] : memref<2x128xf32, #tpu.memory_space<vmem>>, vector<2x128xf32>
      tpu.vector_store %arg7[%c0_48, %c0_49], %103 {strides = array<i32>} : memref<2x128xf32, #tpu.memory_space<vmem>>, vector<2x128xf32>,
    } else {
    }
    %c0 = arith.constant 0 : index
    %c0_1 = arith.constant 0 : index
    %3 = vector.load %arg2[%c0, %c0_1] : memref<16x32xbf16, #tpu.memory_space<vmem>>, vector<16x32xbf16>
    %c0_2 = arith.constant 0 : index
    %c0_3 = arith.constant 0 : index
    %4 = vector.load %arg3[%c0_2, %c0_3] : memref<32x128xbf16, #tpu.memory_space<vmem>>, vector<32x128xbf16>
    %cst = arith.constant dense<0.000000e+00> : vector<16x128xf32>
    %5 = tpu.matmul %3, %4, %cst {dimension_numbers = #tpu.dot_dimension_numbers<[1], [0], [0], [1], [0, 0, 1, 1], [], []>} : vector<16x32xbf16>, vector<32x128xbf16>, vector<16x128xf32> -> vector<16x128xf32>
    %c0_4 = arith.constant 0 : index
    %c0_5 = arith.constant 0 : index
    %6 = vector.load %arg8[%c0_4, %c0_5] : memref<16x128xf32, #tpu.memory_space<vmem>>, vector<16x128xf32>
    tpu.vector_store %arg8[%c0_4, %c0_5], %5 {strides = array<i32>} : memref<16x128xf32, #tpu.memory_space<vmem>>, vector<16x128xf32>,
    %c0_6 = arith.constant 0 : index
    %c0_7 = arith.constant 0 : index
    %7 = vector.load %arg4[%c0_6, %c0_7] : memref<1x128xf32, #tpu.memory_space<vmem>>, vector<1x128xf32>
    %8 = vector.shape_cast %7 : vector<1x128xf32> to vector<1x128xf32>
    %9 = vector.broadcast %8 : vector<1x128xf32> to vector<2x128xf32>
    %c0_8 = arith.constant 0 : index
    %c0_9 = arith.constant 0 : index
    %10 = vector.load %arg5[%c0_8, %c0_9] : memref<1x128xf32, #tpu.memory_space<vmem>>, vector<1x128xf32>
    %11 = vector.shape_cast %10 : vector<1x128xf32> to vector<1x128xf32>
    %12 = vector.broadcast %11 : vector<1x128xf32> to vector<2x128xf32>
    %c0_10 = arith.constant 0 : index
    %c0_11 = arith.constant 0 : index
    %13 = vector.load %arg7[%c0_10, %c0_11] : memref<2x128xf32, #tpu.memory_space<vmem>>, vector<2x128xf32>
    %c0_i32_12 = arith.constant 0 : i32
    %c2_i32 = arith.constant 2 : i32
    %14 = arith.muli %c0_i32_12, %c2_i32 : i32
    %15 = tpu.assume_multiple %14, 2 : i32
    %16 = arith.index_cast %15 : i32 to index
    %c0_13 = arith.constant 0 : index
    %17 = vector.load %arg8[%16, %c0_13] : memref<16x128xf32, #tpu.memory_space<vmem>>, vector<2x128xf32>
    %18 = arith.addf %17, %9 : vector<2x128xf32>
    %19 = arith.mulf %12, %13 : vector<2x128xf32>
    %20 = arith.addf %18, %19 : vector<2x128xf32>
    %cst_14 = arith.constant 0.000000e+00 : f32
    %21 = vector.broadcast %cst_14 : f32 to vector<2x128xf32>
    %22 = arith.maximumf %20, %21 : vector<2x128xf32>
    %23 = arith.index_cast %15 : i32 to index
    %c0_15 = arith.constant 0 : index
    %24 = vector.load %arg6[%23, %c0_15] : memref<16x128xf32, #tpu.memory_space<vmem>>, vector<2x128xf32>
    tpu.vector_store %arg6[%23, %c0_15], %22 {strides = array<i32>} : memref<16x128xf32, #tpu.memory_space<vmem>>, vector<2x128xf32>,
    %c1_i32 = arith.constant 1 : i32
    %c2_i32_16 = arith.constant 2 : i32
    %25 = arith.muli %c1_i32, %c2_i32_16 : i32
    %26 = tpu.assume_multiple %25, 2 : i32
    %27 = arith.index_cast %26 : i32 to index
    %c0_17 = arith.constant 0 : index
    %28 = vector.load %arg8[%27, %c0_17] : memref<16x128xf32, #tpu.memory_space<vmem>>, vector<2x128xf32>
    %29 = arith.addf %28, %9 : vector<2x128xf32>
    %30 = arith.mulf %12, %22 : vector<2x128xf32>
    %31 = arith.addf %29, %30 : vector<2x128xf32>
    %cst_18 = arith.constant 0.000000e+00 : f32
    %32 = vector.broadcast %cst_18 : f32 to vector<2x128xf32>
    %33 = arith.maximumf %31, %32 : vector<2x128xf32>
    %34 = arith.index_cast %26 : i32 to index
    %c0_19 = arith.constant 0 : index
    %35 = vector.load %arg6[%34, %c0_19] : memref<16x128xf32, #tpu.memory_space<vmem>>, vector<2x128xf32>
    tpu.vector_store %arg6[%34, %c0_19], %33 {strides = array<i32>} : memref<16x128xf32, #tpu.memory_space<vmem>>, vector<2x128xf32>,
    %c2_i32_20 = arith.constant 2 : i32
    %c2_i32_21 = arith.constant 2 : i32
    %36 = arith.muli %c2_i32_20, %c2_i32_21 : i32
    %37 = tpu.assume_multiple %36, 2 : i32
    %38 = arith.index_cast %37 : i32 to index
    %c0_22 = arith.constant 0 : index
    %39 = vector.load %arg8[%38, %c0_22] : memref<16x128xf32, #tpu.memory_space<vmem>>, vector<2x128xf32>
    %40 = arith.addf %39, %9 : vector<2x128xf32>
    %41 = arith.mulf %12, %33 : vector<2x128xf32>
    %42 = arith.addf %40, %41 : vector<2x128xf32>
    %cst_23 = arith.constant 0.000000e+00 : f32
    %43 = vector.broadcast %cst_23 : f32 to vector<2x128xf32>
    %44 = arith.maximumf %42, %43 : vector<2x128xf32>
    %45 = arith.index_cast %37 : i32 to index
    %c0_24 = arith.constant 0 : index
    %46 = vector.load %arg6[%45, %c0_24] : memref<16x128xf32, #tpu.memory_space<vmem>>, vector<2x128xf32>
    tpu.vector_store %arg6[%45, %c0_24], %44 {strides = array<i32>} : memref<16x128xf32, #tpu.memory_space<vmem>>, vector<2x128xf32>,
    %c3_i32 = arith.constant 3 : i32
    %c2_i32_25 = arith.constant 2 : i32
    %47 = arith.muli %c3_i32, %c2_i32_25 : i32
    %48 = tpu.assume_multiple %47, 2 : i32
    %49 = arith.index_cast %48 : i32 to index
    %c0_26 = arith.constant 0 : index
    %50 = vector.load %arg8[%49, %c0_26] : memref<16x128xf32, #tpu.memory_space<vmem>>, vector<2x128xf32>
    %51 = arith.addf %50, %9 : vector<2x128xf32>
    %52 = arith.mulf %12, %44 : vector<2x128xf32>
    %53 = arith.addf %51, %52 : vector<2x128xf32>
    %cst_27 = arith.constant 0.000000e+00 : f32
    %54 = vector.broadcast %cst_27 : f32 to vector<2x128xf32>
    %55 = arith.maximumf %53, %54 : vector<2x128xf32>
    %56 = arith.index_cast %48 : i32 to index
    %c0_28 = arith.constant 0 : index
    %57 = vector.load %arg6[%56, %c0_28] : memref<16x128xf32, #tpu.memory_space<vmem>>, vector<2x128xf32>
    tpu.vector_store %arg6[%56, %c0_28], %55 {strides = array<i32>} : memref<16x128xf32, #tpu.memory_space<vmem>>, vector<2x128xf32>,
    %c4_i32 = arith.constant 4 : i32
    %c2_i32_29 = arith.constant 2 : i32
    %58 = arith.muli %c4_i32, %c2_i32_29 : i32
    %59 = tpu.assume_multiple %58, 2 : i32
    %60 = arith.index_cast %59 : i32 to index
    %c0_30 = arith.constant 0 : index
    %61 = vector.load %arg8[%60, %c0_30] : memref<16x128xf32, #tpu.memory_space<vmem>>, vector<2x128xf32>
    %62 = arith.addf %61, %9 : vector<2x128xf32>
    %63 = arith.mulf %12, %55 : vector<2x128xf32>
    %64 = arith.addf %62, %63 : vector<2x128xf32>
    %cst_31 = arith.constant 0.000000e+00 : f32
    %65 = vector.broadcast %cst_31 : f32 to vector<2x128xf32>
    %66 = arith.maximumf %64, %65 : vector<2x128xf32>
    %67 = arith.index_cast %59 : i32 to index
    %c0_32 = arith.constant 0 : index
    %68 = vector.load %arg6[%67, %c0_32] : memref<16x128xf32, #tpu.memory_space<vmem>>, vector<2x128xf32>
    tpu.vector_store %arg6[%67, %c0_32], %66 {strides = array<i32>} : memref<16x128xf32, #tpu.memory_space<vmem>>, vector<2x128xf32>,
    %c5_i32 = arith.constant 5 : i32
    %c2_i32_33 = arith.constant 2 : i32
    %69 = arith.muli %c5_i32, %c2_i32_33 : i32
    %70 = tpu.assume_multiple %69, 2 : i32
    %71 = arith.index_cast %70 : i32 to index
    %c0_34 = arith.constant 0 : index
    %72 = vector.load %arg8[%71, %c0_34] : memref<16x128xf32, #tpu.memory_space<vmem>>, vector<2x128xf32>
    %73 = arith.addf %72, %9 : vector<2x128xf32>
    %74 = arith.mulf %12, %66 : vector<2x128xf32>
    %75 = arith.addf %73, %74 : vector<2x128xf32>
    %cst_35 = arith.constant 0.000000e+00 : f32
    %76 = vector.broadcast %cst_35 : f32 to vector<2x128xf32>
    %77 = arith.maximumf %75, %76 : vector<2x128xf32>
    %78 = arith.index_cast %70 : i32 to index
    %c0_36 = arith.constant 0 : index
    %79 = vector.load %arg6[%78, %c0_36] : memref<16x128xf32, #tpu.memory_space<vmem>>, vector<2x128xf32>
    tpu.vector_store %arg6[%78, %c0_36], %77 {strides = array<i32>} : memref<16x128xf32, #tpu.memory_space<vmem>>, vector<2x128xf32>,
    %c6_i32 = arith.constant 6 : i32
    %c2_i32_37 = arith.constant 2 : i32
    %80 = arith.muli %c6_i32, %c2_i32_37 : i32
    %81 = tpu.assume_multiple %80, 2 : i32
    %82 = arith.index_cast %81 : i32 to index
    %c0_38 = arith.constant 0 : index
    %83 = vector.load %arg8[%82, %c0_38] : memref<16x128xf32, #tpu.memory_space<vmem>>, vector<2x128xf32>
    %84 = arith.addf %83, %9 : vector<2x128xf32>
    %85 = arith.mulf %12, %77 : vector<2x128xf32>
    %86 = arith.addf %84, %85 : vector<2x128xf32>
    %cst_39 = arith.constant 0.000000e+00 : f32
    %87 = vector.broadcast %cst_39 : f32 to vector<2x128xf32>
    %88 = arith.maximumf %86, %87 : vector<2x128xf32>
    %89 = arith.index_cast %81 : i32 to index
    %c0_40 = arith.constant 0 : index
    %90 = vector.load %arg6[%89, %c0_40] : memref<16x128xf32, #tpu.memory_space<vmem>>, vector<2x128xf32>
    tpu.vector_store %arg6[%89, %c0_40], %88 {strides = array<i32>} : memref<16x128xf32, #tpu.memory_space<vmem>>, vector<2x128xf32>,
    %c7_i32 = arith.constant 7 : i32
    %c2_i32_41 = arith.constant 2 : i32
    %91 = arith.muli %c7_i32, %c2_i32_41 : i32
    %92 = tpu.assume_multiple %91, 2 : i32
    %93 = arith.index_cast %92 : i32 to index
    %c0_42 = arith.constant 0 : index
    %94 = vector.load %arg8[%93, %c0_42] : memref<16x128xf32, #tpu.memory_space<vmem>>, vector<2x128xf32>
    %95 = arith.addf %94, %9 : vector<2x128xf32>
    %96 = arith.mulf %12, %88 : vector<2x128xf32>
    %97 = arith.addf %95, %96 : vector<2x128xf32>
    %cst_43 = arith.constant 0.000000e+00 : f32
    %98 = vector.broadcast %cst_43 : f32 to vector<2x128xf32>
    %99 = arith.maximumf %97, %98 : vector<2x128xf32>
    %100 = arith.index_cast %92 : i32 to index
    %c0_44 = arith.constant 0 : index
    %101 = vector.load %arg6[%100, %c0_44] : memref<16x128xf32, #tpu.memory_space<vmem>>, vector<2x128xf32>
    tpu.vector_store %arg6[%100, %c0_44], %99 {strides = array<i32>} : memref<16x128xf32, #tpu.memory_space<vmem>>, vector<2x128xf32>,
    %c8_i32 = arith.constant 8 : i32
    %c0_45 = arith.constant 0 : index
    %c0_46 = arith.constant 0 : index
    %102 = vector.load %arg7[%c0_45, %c0_46] : memref<2x128xf32, #tpu.memory_space<vmem>>, vector<2x128xf32>
    tpu.vector_store %arg7[%c0_45, %c0_46], %99 {strides = array<i32>} : memref<2x128xf32, #tpu.memory_space<vmem>>, vector<2x128xf32>,
    return
  }
  func.func @transform_0(%arg0: i32, %arg1: i32) -> (i32, i32) {
    %c0_i32 = arith.constant 0 : i32
    %c0_i32_0 = arith.constant 0 : i32
    return %arg1, %c0_i32 : i32, i32
  }
  func.func @transform_1(%arg0: i32, %arg1: i32) -> (i32, i32) {
    %c0_i32 = arith.constant 0 : i32
    %c0_i32_0 = arith.constant 0 : i32
    return %c0_i32, %arg0 : i32, i32
  }
  func.func @transform_2(%arg0: i32, %arg1: i32) -> (i32, i32) {
    %c0_i32 = arith.constant 0 : i32
    %c0_i32_0 = arith.constant 0 : i32
    return %c0_i32, %arg0 : i32, i32
  }
  func.func @transform_3(%arg0: i32, %arg1: i32) -> (i32, i32) {
    %c0_i32 = arith.constant 0 : i32
    %c0_i32_0 = arith.constant 0 : i32
    return %c0_i32, %arg0 : i32, i32
  }
  func.func @transform_4(%arg0: i32, %arg1: i32) -> (i32, i32) {
    %c0_i32 = arith.constant 0 : i32
    return %arg1, %arg0 : i32, i32
  }
}

module attributes {stable_mosaic.version = 11 : i64} {
  func.func @_indrnn_kernel(%arg0: i32, %arg1: i32, %arg2: memref<16x4xbf16, #tpu.memory_space<vmem>>, %arg3: memref<4x128xbf16, #tpu.memory_space<vmem>>, %arg4: memref<1x128xf32, #tpu.memory_space<vmem>>, %arg5: memref<1x128xf32, #tpu.memory_space<vmem>>, %arg6: memref<16x128xf32, #tpu.memory_space<vmem>>, %arg7: memref<2x128xf32, #tpu.memory_space<vmem>>, %arg8: memref<16x128xf32, #tpu.memory_space<vmem>>) attributes {dimension_semantics = [#tpu.dimension_semantics<parallel>, #tpu.dimension_semantics<arbitrary>], iteration_bounds = array<i64: 1, 1>, scalar_prefetch = 0 : i64, scratch_operands = 2 : i64, tpu.core_type = #tpu.core_type<tc>, window_params = [{transform_indices = @transform_0, window_bounds = array<i64: 16, 4>}, {transform_indices = @transform_1, window_bounds = array<i64: 4, 128>}, {transform_indices = @transform_2, window_bounds = array<i64: 1, 128>}, {transform_indices = @transform_3, window_bounds = array<i64: 1, 128>}, {transform_indices = @transform_4, window_bounds = array<i64: 16, 128>}]} {
    %c0_i32 = arith.constant 0 : i32
    %0 = arith.cmpi eq, %arg1, %c0_i32 : i32
    %1 = arith.extui %0 : i1 to i32
    %c0_i32_0 = arith.constant 0 : i32
    %2 = arith.cmpi ne, %1, %c0_i32_0 : i32
    scf.if %2 {
      %cst_47 = arith.constant 0.000000e+00 : f32
      %103 = vector.broadcast %cst_47 : f32 to vector<2x128xf32>
      %c0_48 = arith.constant 0 : index
      %c0_49 = arith.constant 0 : index
      %104 = vector.load %arg7[%c0_48, %c0_49] : memref<2x128xf32, #tpu.memory_space<vmem>>, vector<2x128xf32>
      tpu.vector_store %arg7[%c0_48, %c0_49], %103 {strides = array<i32>} : memref<2x128xf32, #tpu.memory_space<vmem>>, vector<2x128xf32>,
    } else {
    }
    %c0 = arith.constant 0 : index
    %c0_1 = arith.constant 0 : index
    %3 = vector.load %arg2[%c0, %c0_1] : memref<16x4xbf16, #tpu.memory_space<vmem>>, vector<16x4xbf16>
    %c0_2 = arith.constant 0 : index
    %c0_3 = arith.constant 0 : index
    %4 = vector.load %arg3[%c0_2, %c0_3] : memref<4x128xbf16, #tpu.memory_space<vmem>>, vector<4x128xbf16>
    %cst = arith.constant dense<0.000000e+00> : vector<16x128xf32>
    %5 = tpu.matmul %3, %4, %cst {dimension_numbers = #tpu.dot_dimension_numbers<[1], [0], [0], [1], [0, 0, 1, 1], [], []>} : vector<16x4xbf16>, vector<4x128xbf16>, vector<16x128xf32> -> vector<16x128xf32>
    %c0_4 = arith.constant 0 : index
    %c0_5 = arith.constant 0 : index
    %6 = vector.load %arg8[%c0_4, %c0_5] : memref<16x128xf32, #tpu.memory_space<vmem>>, vector<16x128xf32>
    tpu.vector_store %arg8[%c0_4, %c0_5], %5 {strides = array<i32>} : memref<16x128xf32, #tpu.memory_space<vmem>>, vector<16x128xf32>,
    %c0_6 = arith.constant 0 : index
    %c0_7 = arith.constant 0 : index
    %7 = vector.load %arg4[%c0_6, %c0_7] : memref<1x128xf32, #tpu.memory_space<vmem>>, vector<1x128xf32>
    %8 = vector.shape_cast %7 : vector<1x128xf32> to vector<1x128xf32>
    %9 = vector.broadcast %8 : vector<1x128xf32> to vector<2x128xf32>
    %c0_8 = arith.constant 0 : index
    %c0_9 = arith.constant 0 : index
    %10 = vector.load %arg5[%c0_8, %c0_9] : memref<1x128xf32, #tpu.memory_space<vmem>>, vector<1x128xf32>
    %11 = vector.shape_cast %10 : vector<1x128xf32> to vector<1x128xf32>
    %12 = vector.broadcast %11 : vector<1x128xf32> to vector<2x128xf32>
    %c0_10 = arith.constant 0 : index
    %c0_11 = arith.constant 0 : index
    %13 = vector.load %arg7[%c0_10, %c0_11] : memref<2x128xf32, #tpu.memory_space<vmem>>, vector<2x128xf32>
    %c0_i32_12 = arith.constant 0 : i32
    %c2_i32 = arith.constant 2 : i32
    %14 = arith.muli %c0_i32_12, %c2_i32 : i32
    %15 = tpu.assume_multiple %14, 2 : i32
    %16 = arith.index_cast %15 : i32 to index
    %c0_13 = arith.constant 0 : index
    %17 = vector.load %arg8[%16, %c0_13] : memref<16x128xf32, #tpu.memory_space<vmem>>, vector<2x128xf32>
    %18 = arith.addf %17, %9 : vector<2x128xf32>
    %19 = arith.mulf %12, %13 : vector<2x128xf32>
    %20 = arith.addf %18, %19 : vector<2x128xf32>
    %cst_14 = arith.constant 0.000000e+00 : f32
    %21 = vector.broadcast %cst_14 : f32 to vector<2x128xf32>
    %22 = arith.maximumf %20, %21 : vector<2x128xf32>
    %23 = arith.index_cast %15 : i32 to index
    %c0_15 = arith.constant 0 : index
    %24 = vector.load %arg6[%23, %c0_15] : memref<16x128xf32, #tpu.memory_space<vmem>>, vector<2x128xf32>
    tpu.vector_store %arg6[%23, %c0_15], %22 {strides = array<i32>} : memref<16x128xf32, #tpu.memory_space<vmem>>, vector<2x128xf32>,
    %c1_i32 = arith.constant 1 : i32
    %c2_i32_16 = arith.constant 2 : i32
    %25 = arith.muli %c1_i32, %c2_i32_16 : i32
    %26 = tpu.assume_multiple %25, 2 : i32
    %27 = arith.index_cast %26 : i32 to index
    %c0_17 = arith.constant 0 : index
    %28 = vector.load %arg8[%27, %c0_17] : memref<16x128xf32, #tpu.memory_space<vmem>>, vector<2x128xf32>
    %29 = arith.addf %28, %9 : vector<2x128xf32>
    %30 = arith.mulf %12, %22 : vector<2x128xf32>
    %31 = arith.addf %29, %30 : vector<2x128xf32>
    %cst_18 = arith.constant 0.000000e+00 : f32
    %32 = vector.broadcast %cst_18 : f32 to vector<2x128xf32>
    %33 = arith.maximumf %31, %32 : vector<2x128xf32>
    %34 = arith.index_cast %26 : i32 to index
    %c0_19 = arith.constant 0 : index
    %35 = vector.load %arg6[%34, %c0_19] : memref<16x128xf32, #tpu.memory_space<vmem>>, vector<2x128xf32>
    tpu.vector_store %arg6[%34, %c0_19], %33 {strides = array<i32>} : memref<16x128xf32, #tpu.memory_space<vmem>>, vector<2x128xf32>,
    %c2_i32_20 = arith.constant 2 : i32
    %c2_i32_21 = arith.constant 2 : i32
    %36 = arith.muli %c2_i32_20, %c2_i32_21 : i32
    %37 = tpu.assume_multiple %36, 2 : i32
    %38 = arith.index_cast %37 : i32 to index
    %c0_22 = arith.constant 0 : index
    %39 = vector.load %arg8[%38, %c0_22] : memref<16x128xf32, #tpu.memory_space<vmem>>, vector<2x128xf32>
    %40 = arith.addf %39, %9 : vector<2x128xf32>
    %41 = arith.mulf %12, %33 : vector<2x128xf32>
    %42 = arith.addf %40, %41 : vector<2x128xf32>
    %cst_23 = arith.constant 0.000000e+00 : f32
    %43 = vector.broadcast %cst_23 : f32 to vector<2x128xf32>
    %44 = arith.maximumf %42, %43 : vector<2x128xf32>
    %45 = arith.index_cast %37 : i32 to index
    %c0_24 = arith.constant 0 : index
    %46 = vector.load %arg6[%45, %c0_24] : memref<16x128xf32, #tpu.memory_space<vmem>>, vector<2x128xf32>
    tpu.vector_store %arg6[%45, %c0_24], %44 {strides = array<i32>} : memref<16x128xf32, #tpu.memory_space<vmem>>, vector<2x128xf32>,
    %c3_i32 = arith.constant 3 : i32
    %c2_i32_25 = arith.constant 2 : i32
    %47 = arith.muli %c3_i32, %c2_i32_25 : i32
    %48 = tpu.assume_multiple %47, 2 : i32
    %49 = arith.index_cast %48 : i32 to index
    %c0_26 = arith.constant 0 : index
    %50 = vector.load %arg8[%49, %c0_26] : memref<16x128xf32, #tpu.memory_space<vmem>>, vector<2x128xf32>
    %51 = arith.addf %50, %9 : vector<2x128xf32>
    %52 = arith.mulf %12, %44 : vector<2x128xf32>
    %53 = arith.addf %51, %52 : vector<2x128xf32>
    %cst_27 = arith.constant 0.000000e+00 : f32
    %54 = vector.broadcast %cst_27 : f32 to vector<2x128xf32>
    %55 = arith.maximumf %53, %54 : vector<2x128xf32>
    %56 = arith.index_cast %48 : i32 to index
    %c0_28 = arith.constant 0 : index
    %57 = vector.load %arg6[%56, %c0_28] : memref<16x128xf32, #tpu.memory_space<vmem>>, vector<2x128xf32>
    tpu.vector_store %arg6[%56, %c0_28], %55 {strides = array<i32>} : memref<16x128xf32, #tpu.memory_space<vmem>>, vector<2x128xf32>,
    %c4_i32 = arith.constant 4 : i32
    %c2_i32_29 = arith.constant 2 : i32
    %58 = arith.muli %c4_i32, %c2_i32_29 : i32
    %59 = tpu.assume_multiple %58, 2 : i32
    %60 = arith.index_cast %59 : i32 to index
    %c0_30 = arith.constant 0 : index
    %61 = vector.load %arg8[%60, %c0_30] : memref<16x128xf32, #tpu.memory_space<vmem>>, vector<2x128xf32>
    %62 = arith.addf %61, %9 : vector<2x128xf32>
    %63 = arith.mulf %12, %55 : vector<2x128xf32>
    %64 = arith.addf %62, %63 : vector<2x128xf32>
    %cst_31 = arith.constant 0.000000e+00 : f32
    %65 = vector.broadcast %cst_31 : f32 to vector<2x128xf32>
    %66 = arith.maximumf %64, %65 : vector<2x128xf32>
    %67 = arith.index_cast %59 : i32 to index
    %c0_32 = arith.constant 0 : index
    %68 = vector.load %arg6[%67, %c0_32] : memref<16x128xf32, #tpu.memory_space<vmem>>, vector<2x128xf32>
    tpu.vector_store %arg6[%67, %c0_32], %66 {strides = array<i32>} : memref<16x128xf32, #tpu.memory_space<vmem>>, vector<2x128xf32>,
    %c5_i32 = arith.constant 5 : i32
    %c2_i32_33 = arith.constant 2 : i32
    %69 = arith.muli %c5_i32, %c2_i32_33 : i32
    %70 = tpu.assume_multiple %69, 2 : i32
    %71 = arith.index_cast %70 : i32 to index
    %c0_34 = arith.constant 0 : index
    %72 = vector.load %arg8[%71, %c0_34] : memref<16x128xf32, #tpu.memory_space<vmem>>, vector<2x128xf32>
    %73 = arith.addf %72, %9 : vector<2x128xf32>
    %74 = arith.mulf %12, %66 : vector<2x128xf32>
    %75 = arith.addf %73, %74 : vector<2x128xf32>
    %cst_35 = arith.constant 0.000000e+00 : f32
    %76 = vector.broadcast %cst_35 : f32 to vector<2x128xf32>
    %77 = arith.maximumf %75, %76 : vector<2x128xf32>
    %78 = arith.index_cast %70 : i32 to index
    %c0_36 = arith.constant 0 : index
    %79 = vector.load %arg6[%78, %c0_36] : memref<16x128xf32, #tpu.memory_space<vmem>>, vector<2x128xf32>
    tpu.vector_store %arg6[%78, %c0_36], %77 {strides = array<i32>} : memref<16x128xf32, #tpu.memory_space<vmem>>, vector<2x128xf32>,
    %c6_i32 = arith.constant 6 : i32
    %c2_i32_37 = arith.constant 2 : i32
    %80 = arith.muli %c6_i32, %c2_i32_37 : i32
    %81 = tpu.assume_multiple %80, 2 : i32
    %82 = arith.index_cast %81 : i32 to index
    %c0_38 = arith.constant 0 : index
    %83 = vector.load %arg8[%82, %c0_38] : memref<16x128xf32, #tpu.memory_space<vmem>>, vector<2x128xf32>
    %84 = arith.addf %83, %9 : vector<2x128xf32>
    %85 = arith.mulf %12, %77 : vector<2x128xf32>
    %86 = arith.addf %84, %85 : vector<2x128xf32>
    %cst_39 = arith.constant 0.000000e+00 : f32
    %87 = vector.broadcast %cst_39 : f32 to vector<2x128xf32>
    %88 = arith.maximumf %86, %87 : vector<2x128xf32>
    %89 = arith.index_cast %81 : i32 to index
    %c0_40 = arith.constant 0 : index
    %90 = vector.load %arg6[%89, %c0_40] : memref<16x128xf32, #tpu.memory_space<vmem>>, vector<2x128xf32>
    tpu.vector_store %arg6[%89, %c0_40], %88 {strides = array<i32>} : memref<16x128xf32, #tpu.memory_space<vmem>>, vector<2x128xf32>,
    %c7_i32 = arith.constant 7 : i32
    %c2_i32_41 = arith.constant 2 : i32
    %91 = arith.muli %c7_i32, %c2_i32_41 : i32
    %92 = tpu.assume_multiple %91, 2 : i32
    %93 = arith.index_cast %92 : i32 to index
    %c0_42 = arith.constant 0 : index
    %94 = vector.load %arg8[%93, %c0_42] : memref<16x128xf32, #tpu.memory_space<vmem>>, vector<2x128xf32>
    %95 = arith.addf %94, %9 : vector<2x128xf32>
    %96 = arith.mulf %12, %88 : vector<2x128xf32>
    %97 = arith.addf %95, %96 : vector<2x128xf32>
    %cst_43 = arith.constant 0.000000e+00 : f32
    %98 = vector.broadcast %cst_43 : f32 to vector<2x128xf32>
    %99 = arith.maximumf %97, %98 : vector<2x128xf32>
    %100 = arith.index_cast %92 : i32 to index
    %c0_44 = arith.constant 0 : index
    %101 = vector.load %arg6[%100, %c0_44] : memref<16x128xf32, #tpu.memory_space<vmem>>, vector<2x128xf32>
    tpu.vector_store %arg6[%100, %c0_44], %99 {strides = array<i32>} : memref<16x128xf32, #tpu.memory_space<vmem>>, vector<2x128xf32>,
    %c8_i32 = arith.constant 8 : i32
    %c0_45 = arith.constant 0 : index
    %c0_46 = arith.constant 0 : index
    %102 = vector.load %arg7[%c0_45, %c0_46] : memref<2x128xf32, #tpu.memory_space<vmem>>, vector<2x128xf32>
    tpu.vector_store %arg7[%c0_45, %c0_46], %99 {strides = array<i32>} : memref<2x128xf32, #tpu.memory_space<vmem>>, vector<2x128xf32>,
    return
  }
  func.func @transform_0(%arg0: i32, %arg1: i32) -> (i32, i32) {
    %c0_i32 = arith.constant 0 : i32
    %c0_i32_0 = arith.constant 0 : i32
    return %arg1, %c0_i32 : i32, i32
  }
  func.func @transform_1(%arg0: i32, %arg1: i32) -> (i32, i32) {
    %c0_i32 = arith.constant 0 : i32
    %c0_i32_0 = arith.constant 0 : i32
    return %c0_i32, %arg0 : i32, i32
  }
  func.func @transform_2(%arg0: i32, %arg1: i32) -> (i32, i32) {
    %c0_i32 = arith.constant 0 : i32
    %c0_i32_0 = arith.constant 0 : i32
    return %c0_i32, %arg0 : i32, i32
  }
  func.func @transform_3(%arg0: i32, %arg1: i32) -> (i32, i32) {
    %c0_i32 = arith.constant 0 : i32
    %c0_i32_0 = arith.constant 0 : i32
    return %c0_i32, %arg0 : i32, i32
  }
  func.func @transform_4(%arg0: i32, %arg1: i32) -> (i32, i32) {
    %c0_i32 = arith.constant 0 : i32
    return %arg1, %arg0 : i32, i32
  }
}

</mosaic_0001>

<bundles_post_ra>
// kernel: indrnn_forward.3
= control target key start
LH: loop header
LB: loop body
LE: loop exit
PB: predicated region body
PF: predicated region fallthrough
CT: control target
= control target key end

     0   :  { %v204_v0 = vmov 0.0   ;;  %vm205_vm0 = vmmov 0   ;;  %vm46_vm1 = vcmask 261120   ;;  %s270_s1 = inlined_call_operand.vmem [shape: bf16[32,128], index: 1, kind: input, shape index: {}]   ;;  %s271_s0 = inlined_call_operand.vmem [shape: bf16[16,32], index: 0, kind: input, shape index: {}]   ;;  %s272_s3 = inlined_call_operand.vmem [shape: f32[1,128], index: 3, kind: input, shape index: {}]   ;;  %s273_s2 = inlined_call_operand.vmem [shape: f32[1,128], index: 2, kind: input, shape index: {}]   ;;  %s274_s4 = inlined_call_operand.vmem [shape: f32[16,128], index: 4, kind: output, shape index: {}]  }
   0x1   :  { %22 = vst [vmem:[#allocation2] sm:$0x3] %v204_v0  ;;  %191 = vmatprep.subr.bf16.mxu0 %v204_v0  ;;  %v201_v1 = vld [vmem:[%s270_s1 + $0x8] sm:$0xff]   ;;  %195 = vmatprep.mubr.msk.bf16.mxu0 %vm205_vm0, %v204_v0  ;;  %v202_v2 = vld [vmem:[%s270_s1] sm:$0xff]  }
   0x2   :  { %192 = vmatpush3.bf16.msra.mxu0 %v201_v1  ;;  %v203_v3 = vld [vmem:[%s271_s0] sm:$0xff]  }
   0x3   :  { %193 = vmatprep.subr.bf16.mxu0 %v204_v0  ;;  %v180_v6 = vld [vmem:[%s272_s3] ss:$0 sm:$0xff] }
   0x4   :  { %v179_v9 = vld [vmem:[%s273_s2] ss:$0 sm:$0xff] }
   0x6   :  { %194 = vmatpush3.bf16.msra.mxu0 %v202_v2 }
   0x8   :  { %v107_v7 = vld [vmem:[#allocation2] sm:$0x3] }
   0x9   :  { %196 = vmatmul.mubr.msk.bf16.vlgmr.msra.gmra.mxu0 %vm46_vm1, %v203_v3  ;;  %v110_v11 = vmul.f32 %v180_v6, %v107_v7 }
  0xc9   :  { %v84_v4 = vpop.f32.mrf.mxu0 }
  0xca   :  { %91 = vst [vmem:[#allocation3] sm:$0xff] %v84_v4 }
  0xcb   :  { %v197_v5 = vpop.f32.mrf.mxu0 }
  0xcd   :  { %v87_v8 = vpop.f32.mrf.mxu0 }
  0xce   :  { %92 = vst [vmem:[#allocation3 + $0x8] sm:$0xff] %v87_v8 }
  0xcf   :  { %v198_v10 = vpop.f32.mrf.mxu0 }
  0xd1   :  { %v108_v12 = vld [vmem:[#allocation3] sm:$0x3]  ;;  %v115_v15 = vld [vmem:[#allocation3 + $0x2] sm:$0x3]  ;;  %v123_v20 = vld [vmem:[#allocation3 + $0x4] sm:$0x3] }
  0xd2   :  { %v109_v13 = vadd.f32 %v179_v9, %v108_v12  ;;  %v116_v17 = vadd.f32 %v179_v9, %v115_v15  ;;  %v124_v22 = vadd.f32 %v179_v9, %v123_v20  ;;  %v131_v25 = vld [vmem:[#allocation3 + $0x6] sm:$0x3] }
  0xd3   :  { %v132_v27 = vadd.f32 %v179_v9, %v131_v25 }
  0xd4   :  { %v111_v14 = vadd.f32 %v110_v11, %v109_v13 }
  0xd5   :  { %v139_v30 = vld [vmem:[#allocation3 + $0x8] sm:$0x3]  ;;  %v147_v35 = vld [vmem:[#allocation3 + $0xa] sm:$0x3]  ;;  %v155_v40 = vld [vmem:[#allocation3 + $0xc] sm:$0x3] }
  0xd6   :  { %v112_v16 = vmax.f32 %v111_v14, 0.0  ;;  %v140_v32 = vadd.f32 %v179_v9, %v139_v30  ;;  %v148_v37 = vadd.f32 %v179_v9, %v147_v35  ;;  %v156_v42 = vadd.f32 %v179_v9, %v155_v40  ;;  %v163_v45 = vld [vmem:[#allocation3 + $0xe] sm:$0x3] }
  0xd7   :  { %v164_v47 = vadd.f32 %v179_v9, %v163_v45 }
  0xd8   :  { %113 = vst [vmem:[%s274_s4] sm:$0x3] %v112_v16  ;;  %v117_v18 = vmul.f32 %v180_v6, %v112_v16 }
  0xda   :  { %v118_v19 = vadd.f32 %v117_v18, %v116_v17 }
  0xdc   :  { %v119_v21 = vmax.f32 %v118_v19, 0.0 }
  0xde   :  { %181 = vst [vmem:[%s274_s4 + $0x2] sm:$0x3] %v119_v21  ;;  %v125_v23 = vmul.f32 %v180_v6, %v119_v21 }
  0xe0   :  { %v126_v24 = vadd.f32 %v125_v23, %v124_v22 }
  0xe2   :  { %v127_v26 = vmax.f32 %v126_v24, 0.0 }
  0xe4   :  { %182 = vst [vmem:[%s274_s4 + $0x4] sm:$0x3] %v127_v26  ;;  %v133_v28 = vmul.f32 %v180_v6, %v127_v26 }
  0xe6   :  { %v134_v29 = vadd.f32 %v133_v28, %v132_v27 }
  0xe8   :  { %v135_v31 = vmax.f32 %v134_v29, 0.0 }
  0xea   :  { %183 = vst [vmem:[%s274_s4 + $0x6] sm:$0x3] %v135_v31  ;;  %v141_v33 = vmul.f32 %v180_v6, %v135_v31 }
  0xec   :  { %v142_v34 = vadd.f32 %v141_v33, %v140_v32 }
  0xee   :  { %v143_v36 = vmax.f32 %v142_v34, 0.0 }
  0xf0   :  { %184 = vst [vmem:[%s274_s4 + $0x8] sm:$0x3] %v143_v36  ;;  %v149_v38 = vmul.f32 %v180_v6, %v143_v36 }
  0xf2   :  { %v150_v39 = vadd.f32 %v149_v38, %v148_v37 }
  0xf4   :  { %v151_v41 = vmax.f32 %v150_v39, 0.0 }
  0xf6   :  { %185 = vst [vmem:[%s274_s4 + $0xa] sm:$0x3] %v151_v41  ;;  %v157_v43 = vmul.f32 %v180_v6, %v151_v41 }
  0xf8   :  { %v158_v44 = vadd.f32 %v157_v43, %v156_v42 }
  0xfa   :  { %v159_v46 = vmax.f32 %v158_v44, 0.0 }
  0xfc   :  { %186 = vst [vmem:[%s274_s4 + $0xc] sm:$0x3] %v159_v46  ;;  %v165_v48 = vmul.f32 %v180_v6, %v159_v46 }
  0xfe   :  { %v166_v49 = vadd.f32 %v165_v48, %v164_v47 }
 0x100   :  { %v167_v50 = vmax.f32 %v166_v49, 0.0 }
 0x102   :  { %187 = vst [vmem:[%s274_s4 + $0xe] sm:$0x3] %v167_v50  ;;  %170 = vst [vmem:[#allocation2] sm:$0x3] %v167_v50 }

// kernel: indrnn_forward.2
= control target key start
LH: loop header
LB: loop body
LE: loop exit
PB: predicated region body
PF: predicated region fallthrough
CT: control target
= control target key end

     0   :  { %vm35_vm0 = vcmask 1041408   ;;  %v186_v0 = vmov 0.0   ;;  %vm187_vm1 = vmmov 0   ;;  %vm31_vm2 = vcmask 31744   ;;  %s249_s1 = inlined_call_operand.vmem [shape: bf16[4,128], index: 1, kind: input, shape index: {}]   ;;  %s250_s0 = inlined_call_operand.vmem [shape: bf16[16,4], index: 0, kind: input, shape index: {}]   ;;  %s251_s3 = inlined_call_operand.vmem [shape: f32[1,128], index: 3, kind: input, shape index: {}]   ;;  %s252_s2 = inlined_call_operand.vmem [shape: f32[1,128], index: 2, kind: input, shape index: {}]   ;;  %s253_s4 = inlined_call_operand.vmem [shape: f32[16,128], index: 4, kind: output, shape index: {}]  }
   0x1   :  { %22 = vst [vmem:[#allocation2] sm:$0x3] %v186_v0  ;;  %177 = vmatprep.subr.bf16.mxu0 %v186_v0  ;;  %v25_v1 = vld [vmem:[%s249_s1] sm:$0x3]  ;;  %179 = vmatprep.mubr.msk.bf16.mxu0 %vm187_vm1, %v186_v0 }
   0x2   :  { %v37_v2 = vsel %vm35_vm0, %v25_v1, 0  ;;  %v185_v3 = vld [vmem:[%s250_s0] sm:$0xff]  }
   0x3   :  { %178 = vmatpush3.bf16.msra.mxu0 %v37_v2  ;;  %v167_v6 = vld [vmem:[%s251_s3] ss:$0 sm:$0xff] }
   0x4   :  { %v166_v9 = vld [vmem:[%s252_s2] ss:$0 sm:$0xff] }
   0x6   :  { %180 = vmatmul.mubr.msk.bf16.vlgmr.msra.gmra.mxu0 %vm31_vm2, %v185_v3 }
   0x8   :  { %v96_v7 = vld [vmem:[#allocation2] sm:$0x3] }
   0x9   :  { %v99_v11 = vmul.f32 %v167_v6, %v96_v7 }
  0xc6   :  { %v73_v4 = vpop.f32.mrf.mxu0 }
  0xc7   :  { %80 = vst [vmem:[#allocation3] sm:$0xff] %v73_v4 }
  0xc8   :  { %v181_v5 = vpop.f32.mrf.mxu0 }
  0xca   :  { %v76_v8 = vpop.f32.mrf.mxu0 }
  0xcb   :  { %81 = vst [vmem:[#allocation3 + $0x8] sm:$0xff] %v76_v8 }
  0xcc   :  { %v182_v10 = vpop.f32.mrf.mxu0 }
  0xce   :  { %v97_v12 = vld [vmem:[#allocation3] sm:$0x3]  ;;  %v104_v15 = vld [vmem:[#allocation3 + $0x2] sm:$0x3]  ;;  %v112_v20 = vld [vmem:[#allocation3 + $0x4] sm:$0x3] }
  0xcf   :  { %v98_v13 = vadd.f32 %v166_v9, %v97_v12  ;;  %v105_v17 = vadd.f32 %v166_v9, %v104_v15  ;;  %v113_v22 = vadd.f32 %v166_v9, %v112_v20  ;;  %v120_v25 = vld [vmem:[#allocation3 + $0x6] sm:$0x3] }
  0xd0   :  { %v121_v27 = vadd.f32 %v166_v9, %v120_v25 }
  0xd1   :  { %v100_v14 = vadd.f32 %v99_v11, %v98_v13 }
  0xd2   :  { %v128_v30 = vld [vmem:[#allocation3 + $0x8] sm:$0x3]  ;;  %v136_v35 = vld [vmem:[#allocation3 + $0xa] sm:$0x3]  ;;  %v144_v40 = vld [vmem:[#allocation3 + $0xc] sm:$0x3] }
  0xd3   :  { %v101_v16 = vmax.f32 %v100_v14, 0.0  ;;  %v129_v32 = vadd.f32 %v166_v9, %v128_v30  ;;  %v137_v37 = vadd.f32 %v166_v9, %v136_v35  ;;  %v145_v42 = vadd.f32 %v166_v9, %v144_v40  ;;  %v152_v45 = vld [vmem:[#allocation3 + $0xe] sm:$0x3] }
  0xd4   :  { %v153_v47 = vadd.f32 %v166_v9, %v152_v45 }
  0xd5   :  { %102 = vst [vmem:[%s253_s4] sm:$0x3] %v101_v16  ;;  %v106_v18 = vmul.f32 %v167_v6, %v101_v16 }
  0xd7   :  { %v107_v19 = vadd.f32 %v106_v18, %v105_v17 }
  0xd9   :  { %v108_v21 = vmax.f32 %v107_v19, 0.0 }
  0xdb   :  { %168 = vst [vmem:[%s253_s4 + $0x2] sm:$0x3] %v108_v21  ;;  %v114_v23 = vmul.f32 %v167_v6, %v108_v21 }
  0xdd   :  { %v115_v24 = vadd.f32 %v114_v23, %v113_v22 }
  0xdf   :  { %v116_v26 = vmax.f32 %v115_v24, 0.0 }
  0xe1   :  { %169 = vst [vmem:[%s253_s4 + $0x4] sm:$0x3] %v116_v26  ;;  %v122_v28 = vmul.f32 %v167_v6, %v116_v26 }
  0xe3   :  { %v123_v29 = vadd.f32 %v122_v28, %v121_v27 }
  0xe5   :  { %v124_v31 = vmax.f32 %v123_v29, 0.0 }
  0xe7   :  { %170 = vst [vmem:[%s253_s4 + $0x6] sm:$0x3] %v124_v31  ;;  %v130_v33 = vmul.f32 %v167_v6, %v124_v31 }
  0xe9   :  { %v131_v34 = vadd.f32 %v130_v33, %v129_v32 }
  0xeb   :  { %v132_v36 = vmax.f32 %v131_v34, 0.0 }
  0xed   :  { %171 = vst [vmem:[%s253_s4 + $0x8] sm:$0x3] %v132_v36  ;;  %v138_v38 = vmul.f32 %v167_v6, %v132_v36 }
  0xef   :  { %v139_v39 = vadd.f32 %v138_v38, %v137_v37 }
  0xf1   :  { %v140_v41 = vmax.f32 %v139_v39, 0.0 }
  0xf3   :  { %172 = vst [vmem:[%s253_s4 + $0xa] sm:$0x3] %v140_v41  ;;  %v146_v43 = vmul.f32 %v167_v6, %v140_v41 }
  0xf5   :  { %v147_v44 = vadd.f32 %v146_v43, %v145_v42 }
  0xf7   :  { %v148_v46 = vmax.f32 %v147_v44, 0.0 }
  0xf9   :  { %173 = vst [vmem:[%s253_s4 + $0xc] sm:$0x3] %v148_v46  ;;  %v154_v48 = vmul.f32 %v167_v6, %v148_v46 }
  0xfb   :  { %v155_v49 = vadd.f32 %v154_v48, %v153_v47 }
  0xfd   :  { %v156_v50 = vmax.f32 %v155_v49, 0.0 }
  0xff   :  { %174 = vst [vmem:[%s253_s4 + $0xe] sm:$0x3] %v156_v50  ;;  %159 = vst [vmem:[#allocation2] sm:$0x3] %v156_v50 }

</bundles_post_ra>
